<compile_context>
chip_gen: v7x
topology: tpu7x:2x2x1
jax: 0.10.0
libtpu: 0.0.40
codegen_flags: <defaults>
</compile_context>

<pallas_src>
import jax
import jax.numpy as jnp
from jax.experimental import pallas as pl
from jax.experimental.pallas import tpu as pltpu


def _avg_ensemble_kernel(x_ref, w_ref, b_ref, o_ref):
    """x: [B, D], w: [D, N_PAD] (pre-averaged over estimators),
    b: [1, N_PAD] (mean bias), o: [B, N_PAD] (lane-dense store)."""
    o_ref[...] = (
        jnp.dot(x_ref[...], w_ref[...], preferred_element_type=jnp.float32)
        + b_ref[...]
    )


def make_avg_ensemble(weights, biases, *, n_pad=128):
    """Pack ensemble params once (like nn.Module init) and return a jitted
    forward fn.

    weights: [E, D, N] per-estimator Linear weights (forward is x @ W_e),
    biases:  [E, 1, N].
    Returns f(x_nchw: [B, C, H, W]) -> [B, N].
    """
    E, D, N = weights.shape
    assert N <= n_pad

    # Linearity: mean_e(x @ W_e + b_e) == x @ mean_e(W_e) + mean_e(b_e).
    # Fold the 1/E average into the parameters at init; only fp32
    # summation-order rounding differs from the per-estimator formulation.
    w_eff = jnp.mean(weights.astype(jnp.float32), axis=0)           # [D, N]
    w_eff = jnp.pad(w_eff, ((0, 0), (0, n_pad - N)))                # [D, N_PAD]
    b_eff = jnp.mean(biases.astype(jnp.float32)[:, 0, :], axis=0)   # [N]
    b_eff = jnp.pad(b_eff, (0, n_pad - N)).reshape(1, n_pad)        # [1, N_PAD]
    # Materialize now so packing never runs in the per-call hot path.
    w_eff, b_eff = jax.block_until_ready((w_eff, b_eff))

    @jax.jit
    def forward(x_nchw):
        B = x_nchw.shape[0]
        d_in = x_nchw.shape[1] * x_nchw.shape[2] * x_nchw.shape[3]
        assert d_in == D
        x2d = x_nchw.reshape(B, D).astype(jnp.float32)

        out_pad = pl.pallas_call(
            _avg_ensemble_kernel,
            out_shape=jax.ShapeDtypeStruct((B, n_pad), jnp.float32),
            grid_spec=pltpu.PrefetchScalarGridSpec(
                num_scalar_prefetch=0,
                grid=(1,),  # single step: whole fused ensemble in one shot
                in_specs=[
                    pl.BlockSpec((B, D), lambda i: (0, 0)),         # x
                    pl.BlockSpec((D, n_pad), lambda i: (0, 0)),     # mean W
                    pl.BlockSpec((1, n_pad), lambda i: (0, 0)),     # mean b
                ],
                out_specs=pl.BlockSpec((B, n_pad), lambda i: (0, 0)),
            ),
            compiler_params=pltpu.CompilerParams(
                dimension_semantics=("arbitrary",),
            ),
        )(x2d, w_eff, b_eff)

        # Slice the lane padding back off (fused inside the same jit).
        return out_pad[:, :N]

    return forward


if __name__ == "__main__":
    # Small shapes consistent with the forward: a batch of NCHW images fed to
    # an ensemble of linear classifiers.
    B, C, H, W = 2, 4, 16, 16
    D = C * H * W
    NUM_CLASSES = 10
    NUM_ESTIMATORS = 3

    key = jax.random.PRNGKey(0)
    kx, kw, kb = jax.random.split(key, 3)

    x = jax.random.normal(kx, (B, C, H, W), dtype=jnp.float32)
    weights = jax.random.normal(kw, (NUM_ESTIMATORS, D, NUM_CLASSES),
                                dtype=jnp.float32) * 0.02
    biases = jax.random.normal(kb, (NUM_ESTIMATORS, 1, NUM_CLASSES),
                               dtype=jnp.float32) * 0.1

    avg_ensemble = make_avg_ensemble(weights, biases)   # packs params once
    out = jax.block_until_ready(avg_ensemble(x))

    # Reference: per-estimator Linear outputs, stacked and averaged
    # (matches torch.stack + mean in AvgEnsemble).
    x2d = x.reshape(B, D)
    ref = jnp.mean(
        jnp.stack([x2d @ weights[e] + biases[e, 0]
                   for e in range(NUM_ESTIMATORS)]),
        axis=0,
    )
    assert out.shape == (B, NUM_CLASSES)
    assert jnp.allclose(out, ref, atol=1e-4, rtol=1e-4), "mismatch vs reference"

    print("KERNEL_OK")
</pallas_src>

<mosaic_0001>
module attributes {stable_mosaic.version = 11 : i64} {
  func.func @_avg_ensemble_kernel(%arg0: i32, %arg1: memref<2x1024xf32, #tpu.memory_space<vmem>>, %arg2: memref<1024x128xf32, #tpu.memory_space<vmem>>, %arg3: memref<1x128xf32, #tpu.memory_space<vmem>>, %arg4: memref<2x128xf32, #tpu.memory_space<vmem>>) attributes {dimension_semantics = [#tpu.dimension_semantics<arbitrary>], iteration_bounds = array<i64: 1>, scalar_prefetch = 0 : i64, scratch_operands = 0 : i64, tpu.core_type = #tpu.core_type<tc>, window_params = [{pipeline_mode = #tpu.pipeline_mode<synchronous>, transform_indices = @transform_0, window_bounds = array<i64: 2, 1024>}, {pipeline_mode = #tpu.pipeline_mode<synchronous>, transform_indices = @transform_1, window_bounds = array<i64: 1024, 128>}, {pipeline_mode = #tpu.pipeline_mode<synchronous>, transform_indices = @transform_2, window_bounds = array<i64: 1, 128>}, {pipeline_mode = #tpu.pipeline_mode<synchronous>, transform_indices = @transform_3, window_bounds = array<i64: 2, 128>}]} {
    %c0 = arith.constant 0 : index
    %c0_0 = arith.constant 0 : index
    %0 = vector.load %arg1[%c0, %c0_0] : memref<2x1024xf32, #tpu.memory_space<vmem>>, vector<2x1024xf32>
    %c0_1 = arith.constant 0 : index
    %c0_2 = arith.constant 0 : index
    %1 = vector.load %arg2[%c0_1, %c0_2] : memref<1024x128xf32, #tpu.memory_space<vmem>>, vector<1024x128xf32>
    %cst = arith.constant dense<0.000000e+00> : vector<2x128xf32>
    %2 = tpu.matmul %0, %1, %cst {dimension_numbers = #tpu.dot_dimension_numbers<[1], [0], [0], [1], [0, 0, 1, 1], [], []>} : vector<2x1024xf32>, vector<1024x128xf32>, vector<2x128xf32> -> vector<2x128xf32>
    %c0_3 = arith.constant 0 : index
    %c0_4 = arith.constant 0 : index
    %3 = vector.load %arg3[%c0_3, %c0_4] : memref<1x128xf32, #tpu.memory_space<vmem>>, vector<1x128xf32>
    %4 = vector.broadcast %3 : vector<1x128xf32> to vector<2x128xf32>
    %5 = arith.addf %2, %4 : vector<2x128xf32>
    %c0_5 = arith.constant 0 : index
    %c0_6 = arith.constant 0 : index
    %6 = vector.load %arg4[%c0_5, %c0_6] : memref<2x128xf32, #tpu.memory_space<vmem>>, vector<2x128xf32>
    tpu.vector_store %arg4[%c0_5, %c0_6], %5 {strides = array<i32>} : memref<2x128xf32, #tpu.memory_space<vmem>>, vector<2x128xf32>,
    return
  }
  func.func @transform_0(%arg0: i32) -> (i32, i32) {
    %c0_i32 = arith.constant 0 : i32
    %c0_i32_0 = arith.constant 0 : i32
    %c0_i32_1 = arith.constant 0 : i32
    return %c0_i32, %c0_i32_0 : i32, i32
  }
  func.func @transform_1(%arg0: i32) -> (i32, i32) {
    %c0_i32 = arith.constant 0 : i32
    %c0_i32_0 = arith.constant 0 : i32
    %c0_i32_1 = arith.constant 0 : i32
    return %c0_i32, %c0_i32_0 : i32, i32
  }
  func.func @transform_2(%arg0: i32) -> (i32, i32) {
    %c0_i32 = arith.constant 0 : i32
    %c0_i32_0 = arith.constant 0 : i32
    %c0_i32_1 = arith.constant 0 : i32
    return %c0_i32, %c0_i32_0 : i32, i32
  }
  func.func @transform_3(%arg0: i32) -> (i32, i32) {
    %c0_i32 = arith.constant 0 : i32
    %c0_i32_0 = arith.constant 0 : i32
    %c0_i32_1 = arith.constant 0 : i32
    return %c0_i32, %c0_i32_0 : i32, i32
  }
}

</mosaic_0001>

<bundles_post_ra>
// kernel: forward.1
= control target key start
LH: loop header
LB: loop body
LE: loop exit
PB: predicated region body
PF: predicated region fallthrough
CT: control target
= control target key end

     0   :  { %8 = vsyncpa [#allocation3], 0  ;;  %s899_s0 = inlined_call_operand.vmem [shape: f32[2,1024], index: 0, kind: input, shape index: {}]   ;;  %s900_s1 = inlined_call_operand.hbm [shape: f32[1024,128], index: 1, kind: input, shape index: {}]   ;;  %s901_s2 = inlined_call_operand.vmem [shape: f32[1,128], index: 2, kind: input, shape index: {}]   ;;  %s902_s3 = inlined_call_operand.hbm [shape: f32[2,128], index: 3, kind: output, shape index: {}]  }
   0x1   :  { %9 = vsyncpa [#allocation4], 0  ;;  %s830_s12 = smov [#allocation2]   ;;  %s782_s16 = scalar_lea.hbm %s900_s1, 16384 }
   0x2   :  { %s17_s13 = sshll.u32 %s830_s12, 4  ;;  %p783_p0 = scmp.ne.s32.totalorder %s900_s1, %s782_s16  ;;  %s18_s13 = int_to_ptr.vmem [resolvable:$true] %s17_s13 }
   0x3   :  { %p786_p1 = scmp.lt.u32.totalorder %s782_s16, %s900_s1 }
   0x5   :  { %p788_p2 = pnand %p786_p1, %p783_p0 }
   0x7   :  { %791 = shalt.err (!%p788_p2)
}
   0x8   :  { %s792_s21 = scalar_lea.vmem %s18_s13, 16384  ;;  %p797_p4 = scmp.lt.s32.totalorder %s18_s13, %s18_s13 }
   0x9   :  { %p793_p3 = scmp.ne.s32.totalorder %s18_s13, %s792_s21  ;;  %p798_p5 = scmp.lt.s32.totalorder %s792_s21, %s792_s21 }
   0xb   :  { %p799_p6 = por %p798_p5, %p797_p4 }
   0xd   :  { %p800_p7 = pnand %p799_p6, %p793_p3 }
   0xf   :  { %803 = shalt.err (!%p800_p7)
}
  0x10   :  { %s831_s22 = smov 128   ;;  %s832_s23 = smov 8  }
  0x11   :  { %23 = dma.hbm_to_vmem [thread:$0]  %s900_s1, 16384, %s18_s13, [#allocation3], %s831_s22, %s831_s22, %s832_s23  }
  0x12   :  { %826 = dma.done.wait [#allocation3], 16384  }
  0x13   :  { %827 = vsyncadd [#allocation3], 4294950912  ;;  %v47_v0 = vld [vmem:[#allocation2 + $0x80] sm:$0xff]  ;;  %v48_v1 = vld [vmem:[#allocation2 + $0x88] sm:$0xff]  ;;  %v833_v47 = vmov 1983009808   ;;  %v172_v49 = vlaneseq }
  0x14   :  { %v31_v2 = vld [vmem:[#allocation2] sm:$0xff]  ;;  %v647_v3 = vpack.c.bf16 %v48_v1, %v47_v0  ;;  %v32_v4 = vld [vmem:[#allocation2 + $0x8] sm:$0xff]  ;;  %v49_v11 = vld [vmem:[#allocation2 + $0x90] sm:$0xff]  ;;  %v170_v48 = vunpack.c.l.s4 %v833_v47  ;;  %s834_s30 = smov [#allocation5]  }
  0x15   :  { %v79_v5 = vld [vmem:[#allocation2 + $0x180] sm:$0xff]  ;;  %v80_v6 = vld [vmem:[#allocation2 + $0x188] sm:$0xff]  ;;  %v649_v7 = vpack.c.bf16 %v32_v4, %v31_v2  ;;  %v50_v13 = vld [vmem:[#allocation2 + $0x98] sm:$0xff]  ;;  %v173_v0 = vshrl.u32 %v172_v49, 7  ;;  %s497_s4 = sshll.u32 %s834_s30, 4  ;;  %s498_s4 = int_to_ptr.vmem [resolvable:$true] %s497_s4 }
  0x16   :  { %v679_v8 = vpack.c.bf16 %v80_v6, %v79_v5  ;;  %v63_v9 = vld [vmem:[#allocation2 + $0x100] sm:$0xff]  ;;  %v64_v10 = vld [vmem:[#allocation2 + $0x108] sm:$0xff]  ;;  %648 = vmatprep.subr.bf16.mxu0 %v647_v3  ;;  %v33_v14 = vld [vmem:[#allocation2 + $0x10] sm:$0xff]  ;;  %v651_v16 = vpack.c.bf16 %v50_v13, %v49_v11  ;;  %v171_v63 = vunpack.c.0.s8 %v170_v48  ;;  %p809_p9 = scmp.lt.s32.totalorder %s498_s4, %s498_s4 }
  0x17   :  { %v681_v12 = vpack.c.bf16 %v64_v10, %v63_v9  ;;  %v34_v15 = vld [vmem:[#allocation2 + $0x18] sm:$0xff]  ;;  %650 = vmatpush3.bf16.msra.mxu0 %v649_v7  ;;  %v81_v18 = vld [vmem:[#allocation2 + $0x190] sm:$0xff]  ;;  %v51_v23 = vld [vmem:[#allocation2 + $0xa0] sm:$0xff] }
  0x18   :  { %680 = vmatprep.subr.bf16.mxu1 %v679_v8  ;;  %v653_v17 = vpack.c.bf16 %v34_v15, %v33_v14  ;;  %v82_v19 = vld [vmem:[#allocation2 + $0x198] sm:$0xff]  ;;  %v65_v20 = vld [vmem:[#allocation2 + $0x110] sm:$0xff]  ;;  %v52_v24 = vld [vmem:[#allocation2 + $0xa8] sm:$0xff]  ;;  %652 = vmatprep.subr.bf16.mxu0 %v651_v16  ;;  %v867_v13 = vsub.s32 %v171_v63, %v173_v0 }
  0x19   :  { %682 = vmatpush3.bf16.msra.mxu1 %v681_v12  ;;  %v683_v21 = vpack.c.bf16 %v82_v19, %v81_v18  ;;  %v66_v22 = vld [vmem:[#allocation2 + $0x118] sm:$0xff]  ;;  %v655_v26 = vpack.c.bf16 %v52_v24, %v51_v23  ;;  %v35_v27 = vld [vmem:[#allocation2 + $0x20] sm:$0xff]  ;;  %v36_v28 = vld [vmem:[#allocation2 + $0x28] sm:$0xff] }
  0x1a   :  { %v685_v25 = vpack.c.bf16 %v66_v22, %v65_v20  ;;  %v83_v29 = vld [vmem:[#allocation2 + $0x1a0] sm:$0xff]  ;;  %v84_v30 = vld [vmem:[#allocation2 + $0x1a8] sm:$0xff]  ;;  %v657_v33 = vpack.c.bf16 %v36_v28, %v35_v27  ;;  %v53_v35 = vld [vmem:[#allocation2 + $0xb0] sm:$0xff] }
  0x1b   :  { %684 = vmatprep.subr.bf16.mxu1 %v683_v21  ;;  %v67_v31 = vld [vmem:[#allocation2 + $0x120] sm:$0xff]  ;;  %v68_v32 = vld [vmem:[#allocation2 + $0x128] sm:$0xff]  ;;  %654 = vmatpush3.bf16.msra.mxu0 %v653_v17  ;;  %v687_v34 = vpack.c.bf16 %v84_v30, %v83_v29  ;;  %v54_v36 = vld [vmem:[#allocation2 + $0xb8] sm:$0xff] }
  0x1c   :  { %v37_v37 = vld [vmem:[#allocation2 + $0x30] sm:$0xff]  ;;  %656 = vmatprep.subr.bf16.mxu0 %v655_v26  ;;  %v689_v38 = vpack.c.bf16 %v68_v32, %v67_v31  ;;  %v659_v39 = vpack.c.bf16 %v54_v36, %v53_v35  ;;  %v38_v40 = vld [vmem:[#allocation2 + $0x38] sm:$0xff]  ;;  %v55_v46 = vld [vmem:[#allocation2 + $0xc0] sm:$0xff] }
  0x1d   :  { %686 = vmatpush3.bf16.msra.mxu1 %v685_v25  ;;  %v85_v41 = vld [vmem:[#allocation2 + $0x1b0] sm:$0xff]  ;;  %v86_v42 = vld [vmem:[#allocation2 + $0x1b8] sm:$0xff]  ;;  %v56_v50 = vld [vmem:[#allocation2 + $0xc8] sm:$0xff]  ;;  %v661_v51 = vpack.c.bf16 %v38_v40, %v37_v37 }
  0x1e   :  { %688 = vmatprep.subr.bf16.mxu1 %v687_v34  ;;  %v691_v43 = vpack.c.bf16 %v86_v42, %v85_v41  ;;  %v69_v44 = vld [vmem:[#allocation2 + $0x130] sm:$0xff]  ;;  %v70_v45 = vld [vmem:[#allocation2 + $0x138] sm:$0xff]  ;;  %v87_v52 = vld [vmem:[#allocation2 + $0x1c0] sm:$0xff]  ;;  %v663_v55 = vpack.c.bf16 %v56_v50, %v55_v46 }
  0x1f   :  { %658 = vmatpush3.bf16.msra.mxu0 %v657_v33  ;;  %v88_v53 = vld [vmem:[#allocation2 + $0x1c8] sm:$0xff]  ;;  %v693_v54 = vpack.c.bf16 %v70_v45, %v69_v44  ;;  %v39_v56 = vld [vmem:[#allocation2 + $0x40] sm:$0xff]  ;;  %v57_v61 = vld [vmem:[#allocation2 + $0xd0] sm:$0xff] }
  0x20   :  { %660 = vmatprep.subr.bf16.mxu0 %v659_v39  ;;  %v40_v57 = vld [vmem:[#allocation2 + $0x48] sm:$0xff]  ;;  %v71_v58 = vld [vmem:[#allocation2 + $0x140] sm:$0xff]  ;;  %v695_v59 = vpack.c.bf16 %v88_v53, %v87_v52  ;;  %v58_v62 = vld [vmem:[#allocation2 + $0xd8] sm:$0xff] }
  0x21   :  { %690 = vmatpush3.bf16.msra.mxu1 %v689_v38  ;;  %v72_v60 = vld [vmem:[#allocation2 + $0x148] sm:$0xff]  ;;  %v89_v1 = vld [vmem:[#allocation2 + $0x1d0] sm:$0xff]  ;;  %v90_v2 = vld [vmem:[#allocation2 + $0x1d8] sm:$0xff]  ;;  %v665_v3 = vpack.c.bf16 %v40_v57, %v39_v56  ;;  %v667_v5 = vpack.c.bf16 %v58_v62, %v57_v61 }
  0x22   :  { %692 = vmatprep.subr.bf16.mxu1 %v691_v43  ;;  %v697_v4 = vpack.c.bf16 %v72_v60, %v71_v58  ;;  %v41_v6 = vld [vmem:[#allocation2 + $0x50] sm:$0xff]  ;;  %v42_v7 = vld [vmem:[#allocation2 + $0x58] sm:$0xff]  ;;  %v699_v9 = vpack.c.bf16 %v90_v2, %v89_v1  ;;  %v59_v11 = vld [vmem:[#allocation2 + $0xe0] sm:$0xff] }
  0x23   :  { %662 = vmatpush3.bf16.msra.mxu0 %v661_v51  ;;  %v73_v8 = vld [vmem:[#allocation2 + $0x150] sm:$0xff]  ;;  %v74_v10 = vld [vmem:[#allocation2 + $0x158] sm:$0xff]  ;;  %v60_v12 = vld [vmem:[#allocation2 + $0xe8] sm:$0xff]  ;;  %v669_v16 = vpack.c.bf16 %v42_v7, %v41_v6 }
  0x24   :  { %664 = vmatprep.subr.bf16.mxu0 %v663_v55  ;;  %v91_v14 = vld [vmem:[#allocation2 + $0x1e0] sm:$0xff]  ;;  %v92_v15 = vld [vmem:[#allocation2 + $0x1e8] sm:$0xff]  ;;  %v701_v18 = vpack.c.bf16 %v74_v10, %v73_v8  ;;  %v671_v19 = vpack.c.bf16 %v60_v12, %v59_v11  ;;  %v61_v25 = vld [vmem:[#allocation2 + $0xf0] sm:$0xff] }
  0x25   :  { %694 = vmatpush3.bf16.msra.mxu1 %v693_v54  ;;  %v43_v17 = vld [vmem:[#allocation2 + $0x60] sm:$0xff]  ;;  %v44_v20 = vld [vmem:[#allocation2 + $0x68] sm:$0xff]  ;;  %v703_v23 = vpack.c.bf16 %v92_v15, %v91_v14  ;;  %v62_v26 = vld [vmem:[#allocation2 + $0xf8] sm:$0xff] }
  0x26   :  { %696 = vmatprep.subr.bf16.mxu1 %v695_v59  ;;  %v75_v21 = vld [vmem:[#allocation2 + $0x160] sm:$0xff]  ;;  %v76_v24 = vld [vmem:[#allocation2 + $0x168] sm:$0xff]  ;;  %v93_v29 = vld [vmem:[#allocation2 + $0x1f0] sm:$0xff]  ;;  %v673_v31 = vpack.c.bf16 %v44_v20, %v43_v17  ;;  %v675_v35 = vpack.c.bf16 %v62_v26, %v61_v25 }
  0x27   :  { %666 = vmatpush3.bf16.msra.mxu0 %v665_v3  ;;  %v29_v22 = vld [vmem:[%s899_s0] sm:$0xff]  ;;  %v94_v30 = vld [vmem:[#allocation2 + $0x1f8] sm:$0xff]  ;;  %v705_v34 = vpack.c.bf16 %v76_v24, %v75_v21  ;;  %v45_v36 = vld [vmem:[#allocation2 + $0x70] sm:$0xff] }
  0x28   :  { %668 = vmatprep.subr.bf16.mxu0 %v667_v5  ;;  %v175_v27 = vrot.slane %v29_v22, %v867_v13  ;;  %v168_v28 = vcombine.high %v29_v22, %v29_v22  ;;  %v46_v37 = vld [vmem:[#allocation2 + $0x78] sm:$0xff]  ;;  %v77_v38 = vld [vmem:[#allocation2 + $0x170] sm:$0xff]  ;;  %v707_v39 = vpack.c.bf16 %v94_v30, %v93_v29  ;;  %v111_v41 = vld [vmem:[#allocation2 + $0x280] sm:$0xff] }
  0x29   :  { %698 = vmatpush3.bf16.msra.mxu1 %v697_v4  ;;  %v78_v40 = vld [vmem:[#allocation2 + $0x178] sm:$0xff]  ;;  %v112_v42 = vld [vmem:[#allocation2 + $0x288] sm:$0xff]  ;;  %v143_v44 = vld [vmem:[#allocation2 + $0x380] sm:$0xff]  ;;  %v677_v46 = vpack.c.bf16 %v46_v37, %v45_v36 }
  0x2a   :  { %700 = vmatprep.subr.bf16.mxu1 %v699_v9  ;;  %v183_v32 = vcombine.high %v175_v27, %v175_v27  ;;  %v182_v33 = vrot.slane %v168_v28, %v867_v13  ;;  %v144_v45 = vld [vmem:[#allocation2 + $0x388] sm:$0xff]  ;;  %v709_v47 = vpack.c.bf16 %v78_v40, %v77_v38  ;;  %v711_v48 = vpack.c.bf16 %v112_v42, %v111_v41  ;;  %v95_v49 = vld [vmem:[#allocation2 + $0x200] sm:$0xff]  ;;  %v113_v54 = vld [vmem:[#allocation2 + $0x290] sm:$0xff] }
  0x2b   :  { %670 = vmatpush3.bf16.msra.mxu0 %v669_v16  ;;  %v96_v50 = vld [vmem:[#allocation2 + $0x208] sm:$0xff]  ;;  %v127_v51 = vld [vmem:[#allocation2 + $0x300] sm:$0xff]  ;;  %v743_v52 = vpack.c.bf16 %v144_v45, %v143_v44  ;;  %v114_v55 = vld [vmem:[#allocation2 + $0x298] sm:$0xff] }
  0x2c   :  { %672 = vmatprep.subr.bf16.mxu0 %v671_v19  ;;  %274 = vmatprep.mubr.f32.mxu0 %v183_v32  ;;  %v184_v43 = vcombine.high %v182_v33, %v182_v33  ;;  %v128_v53 = vld [vmem:[#allocation2 + $0x308] sm:$0xff]  ;;  %v145_v56 = vld [vmem:[#allocation2 + $0x390] sm:$0xff]  ;;  %v146_v57 = vld [vmem:[#allocation2 + $0x398] sm:$0xff]  ;;  %v713_v58 = vpack.c.bf16 %v96_v50, %v95_v49  ;;  %v715_v60 = vpack.c.bf16 %v114_v55, %v113_v54 }
  0x2d   :  { %702 = vmatpush3.bf16.msra.mxu1 %v701_v18  ;;  %v745_v59 = vpack.c.bf16 %v128_v53, %v127_v51  ;;  %v97_v61 = vld [vmem:[#allocation2 + $0x210] sm:$0xff]  ;;  %v98_v62 = vld [vmem:[#allocation2 + $0x218] sm:$0xff]  ;;  %v747_v0 = vpack.c.bf16 %v146_v57, %v145_v56  ;;  %v115_v2 = vld [vmem:[#allocation2 + $0x2a0] sm:$0xff] }
  0x2e   :  { %704 = vmatprep.subr.bf16.mxu1 %v703_v23  ;;  %344 = vmatprep.mubr.f32.mxu1 %v184_v43  ;;  %v129_v63 = vld [vmem:[#allocation2 + $0x310] sm:$0xff]  ;;  %v130_v1 = vld [vmem:[#allocation2 + $0x318] sm:$0xff]  ;;  %v116_v3 = vld [vmem:[#allocation2 + $0x2a8] sm:$0xff]  ;;  %v717_v6 = vpack.c.bf16 %v98_v62, %v97_v61 }
  0x2f   :  { %674 = vmatpush3.bf16.msra.mxu0 %v673_v31  ;;  %v147_v4 = vld [vmem:[#allocation2 + $0x3a0] sm:$0xff]  ;;  %v148_v5 = vld [vmem:[#allocation2 + $0x3a8] sm:$0xff]  ;;  %v749_v7 = vpack.c.bf16 %v130_v1, %v129_v63  ;;  %v719_v8 = vpack.c.bf16 %v116_v3, %v115_v2  ;;  %v117_v15 = vld [vmem:[#allocation2 + $0x2b0] sm:$0xff] }
  0x30   :  { %676 = vmatprep.subr.bf16.mxu0 %v675_v35  ;;  %v99_v9 = vld [vmem:[#allocation2 + $0x220] sm:$0xff]  ;;  %v100_v10 = vld [vmem:[#allocation2 + $0x228] sm:$0xff]  ;;  %v751_v12 = vpack.c.bf16 %v148_v5, %v147_v4  ;;  %v118_v16 = vld [vmem:[#allocation2 + $0x2b8] sm:$0xff] }
  0x31   :  { %706 = vmatpush3.bf16.msra.mxu1 %v705_v34  ;;  %v131_v11 = vld [vmem:[#allocation2 + $0x320] sm:$0xff]  ;;  %v132_v14 = vld [vmem:[#allocation2 + $0x328] sm:$0xff]  ;;  %v149_v17 = vld [vmem:[#allocation2 + $0x3b0] sm:$0xff]  ;;  %v721_v19 = vpack.c.bf16 %v100_v10, %v99_v9  ;;  %v723_v21 = vpack.c.bf16 %v118_v16, %v117_v15 }
  0x32   :  { %708 = vmatprep.subr.bf16.mxu1 %v707_v39  ;;  %v150_v18 = vld [vmem:[#allocation2 + $0x3b8] sm:$0xff]  ;;  %v753_v20 = vpack.c.bf16 %v132_v14, %v131_v11  ;;  %v101_v22 = vld [vmem:[#allocation2 + $0x230] sm:$0xff]  ;;  %v120_v28 = vld [vmem:[#allocation2 + $0x2c8] sm:$0xff] }
  0x33   :  { %678 = vmatpush3.bf16.msra.mxu0 %v677_v46  ;;  %v102_v23 = vld [vmem:[#allocation2 + $0x238] sm:$0xff]  ;;  %v133_v24 = vld [vmem:[#allocation2 + $0x330] sm:$0xff]  ;;  %v755_v25 = vpack.c.bf16 %v150_v18, %v149_v17  ;;  %v151_v29 = vld [vmem:[#allocation2 + $0x3c0] sm:$0xff] }
  0x34   :  { %712 = vmatprep.subr.bf16.mxu0 %v711_v48  ;;  %v134_v26 = vld [vmem:[#allocation2 + $0x338] sm:$0xff]  ;;  %v152_v30 = vld [vmem:[#allocation2 + $0x3c8] sm:$0xff]  ;;  %v725_v32 = vpack.c.bf16 %v102_v23, %v101_v22  ;;  %v103_v37 = vld [vmem:[#allocation2 + $0x240] sm:$0xff] }
  0x35   :  { %710 = vmatpush3.bf16.msra.mxu1 %v709_v47  ;;  %v30_v31 = vld [vmem:[%s899_s0 + $0x8] sm:$0xff]  ;;  %v757_v35 = vpack.c.bf16 %v134_v26, %v133_v24  ;;  %v135_v39 = vld [vmem:[#allocation2 + $0x340] sm:$0xff]  ;;  %v759_v40 = vpack.c.bf16 %v152_v30, %v151_v29  ;;  %v121_v42 = vld [vmem:[#allocation2 + $0x2d0] sm:$0xff] }
  0x36   :  { %744 = vmatprep.subr.bf16.mxu1 %v743_v52  ;;  %275 = vmatmul.mubr.f32.vlgmr.msra.gmra.mrb[0].mxu0 %v175_v27  ;;  %v119_v27 = vld [vmem:[#allocation2 + $0x2c0] sm:$0xff]  ;;  %v185_v34 = vcombine.high %v30_v31, %v30_v31  ;;  %v104_v38 = vld [vmem:[#allocation2 + $0x248] sm:$0xff]  ;;  %v122_v43 = vld [vmem:[#allocation2 + $0x2d8] sm:$0xff] }
  0x37   :  { %714 = vmatpush3.bf16.msra.mxu0 %v713_v58  ;;  %v727_v36 = vpack.c.bf16 %v120_v28, %v119_v27  ;;  %v136_v41 = vld [vmem:[#allocation2 + $0x348] sm:$0xff]  ;;  %v153_v46 = vld [vmem:[#allocation2 + $0x3d0] sm:$0xff]  ;;  %v154_v47 = vld [vmem:[#allocation2 + $0x3d8] sm:$0xff]  ;;  %v729_v48 = vpack.c.bf16 %v104_v38, %v103_v37  ;;  %v731_v51 = vpack.c.bf16 %v122_v43, %v121_v42 }
  0x38   :  { %345 = vmatmul.mubr.f32.vlgmr.msra.gmra.mrb[0].mxu1 %v182_v33  ;;  %716 = vmatprep.subr.bf16.mxu0 %v715_v60  ;;  %v878_v33 = vrot.slane %v30_v31, %v867_v13  ;;  %v199_v45 = vrot.slane %v185_v34, %v867_v13  ;;  %v761_v50 = vpack.c.bf16 %v136_v41, %v135_v39  ;;  %v105_v52 = vld [vmem:[#allocation2 + $0x250] sm:$0xff]  ;;  %v106_v53 = vld [vmem:[#allocation2 + $0x258] sm:$0xff]  ;;  %v123_v57 = vld [vmem:[#allocation2 + $0x2e0] sm:$0xff] }
  0x39   :  { %746 = vmatpush3.bf16.msra.mxu1 %v745_v59  ;;  %v137_v54 = vld [vmem:[#allocation2 + $0x350] sm:$0xff]  ;;  %v763_v55 = vpack.c.bf16 %v154_v47, %v153_v46  ;;  %v138_v56 = vld [vmem:[#allocation2 + $0x358] sm:$0xff]  ;;  %v124_v58 = vld [vmem:[#allocation2 + $0x2e8] sm:$0xff]  ;;  %v733_v60 = vpack.c.bf16 %v106_v53, %v105_v52 }
  0x3a   :  { %748 = vmatprep.subr.bf16.mxu1 %v747_v0  ;;  %v200_v44 = vcombine.high %v878_v33, %v878_v33  ;;  %v201_v49 = vcombine.high %v199_v45, %v199_v45  ;;  %v155_v13 = vld [vmem:[#allocation2 + $0x3e0] sm:$0xff]  ;;  %v156_v59 = vld [vmem:[#allocation2 + $0x3e8] sm:$0xff]  ;;  %v765_v61 = vpack.c.bf16 %v138_v56, %v137_v54  ;;  %v735_v62 = vpack.c.bf16 %v124_v58, %v123_v57  ;;  %v125_v4 = vld [vmem:[#allocation2 + $0x2f0] sm:$0xff] }
  0x3b   :  { %718 = vmatpush3.bf16.msra.mxu0 %v717_v6  ;;  %v107_v63 = vld [vmem:[#allocation2 + $0x260] sm:$0xff]  ;;  %v108_v0 = vld [vmem:[#allocation2 + $0x268] sm:$0xff]  ;;  %v767_v2 = vpack.c.bf16 %v156_v59, %v155_v13  ;;  %v126_v5 = vld [vmem:[#allocation2 + $0x2f8] sm:$0xff] }
  0x3c   :  { %720 = vmatprep.subr.bf16.mxu0 %v719_v8  ;;  %414 = vmatprep.mubr.f32.mxu0 %v200_v44  ;;  %v139_v1 = vld [vmem:[#allocation2 + $0x360] sm:$0xff]  ;;  %v140_v3 = vld [vmem:[#allocation2 + $0x368] sm:$0xff]  ;;  %v157_v6 = vld [vmem:[#allocation2 + $0x3f0] sm:$0xff]  ;;  %v737_v8 = vpack.c.bf16 %v108_v0, %v107_v63  ;;  %v739_v10 = vpack.c.bf16 %v126_v5, %v125_v4 }
  0x3d   :  { %750 = vmatpush3.bf16.msra.mxu1 %v749_v7  ;;  %484 = vmatprep.mubr.f32.mxu1 %v201_v49  ;;  %v158_v7 = vld [vmem:[#allocation2 + $0x3f8] sm:$0xff]  ;;  %v769_v9 = vpack.c.bf16 %v140_v3, %v139_v1  ;;  %v109_v11 = vld [vmem:[#allocation2 + $0x270] sm:$0xff] }
  0x3e   :  { %752 = vmatprep.subr.bf16.mxu1 %v751_v12  ;;  %v110_v12 = vld [vmem:[#allocation2 + $0x278] sm:$0xff]  ;;  %v771_v14 = vpack.c.bf16 %v158_v7, %v157_v6  ;;  %v141_v15 = vld [vmem:[#allocation2 + $0x370] sm:$0xff] }
  0x3f   :  { %722 = vmatpush3.bf16.msra.mxu0 %v721_v19  ;;  %v142_v16 = vld [vmem:[#allocation2 + $0x378] sm:$0xff]  ;;  %v741_v17 = vpack.c.bf16 %v110_v12, %v109_v11 }
  0x40   :  { %724 = vmatprep.subr.bf16.mxu0 %v723_v21  ;;  %v773_v18 = vpack.c.bf16 %v142_v16, %v141_v15 }
  0x41   :  { %754 = vmatpush3.bf16.msra.mxu1 %v753_v20  ;;  %v506_v20 = vld [vmem:[%s901_s2] ss:$0 sm:$0xff]  ;;  %s804_s2 = scalar_lea.vmem %s498_s4, 32 }
  0x42   :  { %756 = vmatprep.subr.bf16.mxu1 %v755_v25  ;;  %p805_p8 = scmp.ne.s32.totalorder %s498_s4, %s804_s2  ;;  %p810_p10 = scmp.lt.s32.totalorder %s804_s2, %s804_s2 }
  0x43   :  { %726 = vmatpush3.bf16.msra.mxu0 %v725_v32 }
  0x44   :  { %728 = vmatprep.subr.bf16.mxu0 %v727_v36  ;;  %p811_p11 = por %p810_p10, %p809_p9 }
  0x45   :  { %758 = vmatpush3.bf16.msra.mxu1 %v757_v35 }
  0x46   :  { %760 = vmatprep.subr.bf16.mxu1 %v759_v40  ;;  %p812_p12 = pnand %p811_p11, %p805_p8 }
  0x47   :  { %730 = vmatpush3.bf16.msra.mxu0 %v729_v48 }
  0x48   :  { %732 = vmatprep.subr.bf16.mxu0 %v731_v51 }
  0x49   :  { %762 = vmatpush3.bf16.msra.mxu1 %v761_v50 }
  0x4a   :  { %764 = vmatprep.subr.bf16.mxu1 %v763_v55 }
  0x4b   :  { %734 = vmatpush3.bf16.msra.mxu0 %v733_v60 }
  0x4c   :  { %736 = vmatprep.subr.bf16.mxu0 %v735_v62 }
  0x4d   :  { %766 = vmatpush3.bf16.msra.mxu1 %v765_v61 }
  0x4e   :  { %768 = vmatprep.subr.bf16.mxu1 %v767_v2 }
  0x4f   :  { %738 = vmatpush3.bf16.msra.mxu0 %v737_v8 }
  0x50   :  { %740 = vmatprep.subr.bf16.mxu0 %v739_v10 }
  0x51   :  { %770 = vmatpush3.bf16.msra.mxu1 %v769_v9 }
  0x52   :  { %772 = vmatprep.subr.bf16.mxu1 %v771_v14 }
  0x53   :  { %742 = vmatpush3.bf16.msra.mxu0 %v741_v17 }
  0x55   :  { %774 = vmatpush3.bf16.msra.mxu1 %v773_v18 }
  0x56   :  { %415 = vmatmul.mubr.f32.vlgmr.msra.gmra.mrb[2].mxu0 %v878_v33 }
  0x58   :  { %485 = vmatmul.mubr.f32.vlgmr.msra.gmra.mrb[2].mxu1 %v199_v45 }
 0x109   :  { %v539_v19 = vpop.f32.mrb[0].mxu0 }
 0x10a   :  { %v540_v21 = vpop.f32.mrb[1].mxu0 }
 0x10b   :  { %v574_v22 = vpop.f32.mrb[0].mxu1  ;;  %v541_v23 = vadd.f32 %v540_v21, %v539_v19 }
 0x10c   :  { %v575_v24 = vpop.f32.mrb[1].mxu1 }
 0x10d   :  { %v576_v25 = vadd.f32 %v575_v24, %v574_v22  ;;  %v277_v26 = vadd.f32 %v541_v23, %v506_v20 }
 0x10f   :  { %v347_v27 = vadd.f32 %v576_v25, %v277_v26 }
 0x129   :  { %v609_v28 = vpop.f32.mrb[2].mxu0 }
 0x12a   :  { %v610_v29 = vpop.f32.mrb[3].mxu0 }
 0x12b   :  { %v644_v30 = vpop.f32.mrb[2].mxu1  ;;  %v611_v31 = vadd.f32 %v610_v29, %v609_v28 }
 0x12c   :  { %v645_v32 = vpop.f32.mrb[3].mxu1 }
 0x12d   :  { %v646_v34 = vadd.f32 %v645_v32, %v644_v30  ;;  %v417_v33 = vadd.f32 %v611_v31, %v347_v27 }
 0x12f   :  { %v487_v35 = vadd.f32 %v646_v34, %v417_v33 }
 0x131   :  { %490 = vst [vmem:[#allocation5] sm:$0x3] %v487_v35 }
 0x132   :  { %815 = shalt.err (!%p812_p12)
}
 0x133   :  { %s816_s7 = scalar_lea.hbm %s902_s3, 32 }
 0x134   :  { %p817_p13 = scmp.ne.s32.totalorder %s902_s3, %s816_s7  ;;  %p820_p0 = scmp.lt.u32.totalorder %s816_s7, %s902_s3 }
 0x136   :  { %p822_p1 = pnand %p820_p0, %p817_p13 }
 0x138   :  { %825 = shalt.err (!%p822_p1)
}
 0x139   :  { %500 = dma.vmem_to_hbm [thread:$0]  %s498_s4, 32, %s902_s3, [#allocation4]  }
 0x13a   :  { %828 = dma.done.wait [#allocation4], 32  }
 0x13b   :  { %829 = vsyncadd [#allocation4], 4294967264 }
 0x13c   :  { %504 = vsyncpa [#allocation3], 1 }
 0x13d   :  { %505 = vsyncpa [#allocation4], 1 }

</bundles_post_ra>
